<compile_context>
chip_gen: v7x
topology: tpu7x:2x2x1
jax: 0.10.0
libtpu: 0.0.40
codegen_flags: <defaults>
</compile_context>

<pallas_src>
import jax
import jax.numpy as jnp
from jax.experimental import pallas as pl
from jax.experimental.pallas import tpu as pltpu


def _mlp_kernel(xT_ref, w1_ref, b1_ref, w2_ref, b2_ref, w23_ref, b23_ref,
                probsT_ref, x2T_ref):
    # Batch sits on the lane (last) axis -> every store is lane-dense.
    # xT_ref  : (Din, block_b)   current batch tile, transposed
    # w1_ref  : (H1, Din)  w2_ref: (H2, H1)  w23_ref: (Dout, H1)  (PyTorch (out,in))
    # b*_ref  : (out, 1) f32 column biases (broadcast along lanes)
    xT = xT_ref[...]                                          # native dtype

    # fc1 -> dropout (eval-mode identity) -> relu
    # TODO(synk): training-mode dropout (p=0.3) would need pltpu.prng_seed +
    # pltpu.stateful_bernoulli; this is the eval-mode forward (identity).
    h1 = jnp.dot(w1_ref[...], xT, preferred_element_type=jnp.float32)
    h1 = jnp.maximum(h1 + b1_ref[...], 0.0)                   # (H1, block_b) f32
    h1c = h1.astype(xT.dtype)

    # fc2 (second returned tensor) and fused fc3 (logits = (W3 W2) h1 + W3 b2 + b3).
    # Both MXU pushes depend only on h1 -> no serial x2 -> logits dependency.
    x2 = jnp.dot(w2_ref[...], h1c,
                 preferred_element_type=jnp.float32) + b2_ref[...]
    logits = jnp.dot(w23_ref[...], h1c,
                     preferred_element_type=jnp.float32) + b23_ref[...]

    # Softmax over the feature axis (sublane axis here): XLU reductions, f32 math.
    m = jnp.max(logits, axis=0, keepdims=True)
    e = jnp.exp(logits - m)
    denom = jnp.sum(e, axis=0, keepdims=True)
    r = pl.reciprocal(denom, approx=True)                     # EUP slot (cheap)
    r = r * (2.0 - denom * r)                                 # Newton refine (VPU)

    probsT_ref[...] = (e * r).astype(probsT_ref.dtype)
    x2T_ref[...] = x2.astype(x2T_ref.dtype)


def _choose_block_b(B, din, h1, h2, dout, itemsize):
    """Batch (lane-axis) tile size.

    * block_b is the lane dimension of every tile: multiples of 256 give
      unmasked lane-dense stores and fill the v6e/v7x MXU (2x256x256); 256 is
      also 2x the v5e tile (4x128x128).
    * Tiny batches: a single grid step is strictly cheaper than two micro-steps
      (per-step pipeline overhead ~0.35 us).
    * Large batches: VMEM-budget-driven ceiling that fits v5e's 16 MiB scoped
      default and leaves ample headroom on v7x's 64 MiB physical VMEM, while
      keeping >= 2 grid steps so both v7x TensorCores get work.
    """
    m_tile = 256
    if B <= 2 * m_tile:
        return B
    # Per-batch-column VMEM: double-buffered pipelined tiles (x^T, probs^T,
    # x2^T) plus f32 in-kernel intermediates (h1, logits, exp, probs).
    col_bytes = 2 * (din + h2 + dout) * itemsize + 4 * (h1 + h2 + 3 * dout)
    budget = 12 << 20
    cap = (budget // col_bytes) // m_tile * m_tile
    cap = int(max(m_tile, min(cap, 2048)))
    blk = (B // 2) // m_tile * m_tile          # >= 2 steps, multiple of 256
    return max(m_tile, min(cap, blk))


def mlp_forward(x, w1, b1, w2, b2, w3, b3, *, block_b=None):
    """x: (B, Din); w1: (H1, Din); w2: (H2, H1); w3: (Dout, H2); b*: (out,)."""
    B, Din = x.shape
    H1 = w1.shape[0]
    H2 = w2.shape[0]
    Dout = w3.shape[0]
    dtype = x.dtype
    itemsize = jnp.dtype(dtype).itemsize

    # Parameter glue (plain JAX, outside the kernel):
    #  * batch goes on the lane axis, so weights are used in native (out, in)
    #    layout (no transposes);
    #  * fc3 is folded through fc2 for the logits path.
    f32 = jnp.float32
    w23 = (w3.astype(f32) @ w2.astype(f32)).astype(dtype)       # (Dout, H1)
    b23 = w3.astype(f32) @ b2.astype(f32) + b3.astype(f32)      # (Dout,)
    xT = x.T                                                    # (Din, B)
    w1c = w1.astype(dtype)
    w2c = w2.astype(dtype)
    b1c = b1.astype(f32).reshape(H1, 1)
    b2c = b2.astype(f32).reshape(H2, 1)
    b23c = b23.reshape(Dout, 1)

    if block_b is None:
        block_b = _choose_block_b(B, Din, H1, H2, Dout, itemsize)
    grid = (pl.cdiv(B, block_b),)

    cost = pl.CostEstimate(
        flops=2 * B * (Din * H1 + H1 * H2 + H1 * Dout),
        transcendentals=B * (Dout + 1),                         # exp + reciprocal
        bytes_accessed=(x.size + w1.size + w2.size + w23.size) * itemsize
        + (b1.size + b2.size + b23.size) * 4
        + (B * Dout + B * H2) * itemsize,
    )

    def call(single_buffer_consts):
        def const_spec(shape):
            # Constant-index operands: a second pipeline buffer is pure VMEM waste.
            if single_buffer_consts:
                return pl.BlockSpec(shape, lambda i: (0, 0),
                                    pipeline_mode=pl.Buffered(1))
            return pl.BlockSpec(shape, lambda i: (0, 0))

        return pl.pallas_call(
            _mlp_kernel,
            out_shape=(
                jax.ShapeDtypeStruct((Dout, B), dtype),         # probs^T
                jax.ShapeDtypeStruct((H2, B), dtype),           # x2^T
            ),
            grid_spec=pltpu.PrefetchScalarGridSpec(
                num_scalar_prefetch=0,
                grid=grid,
                in_specs=[
                    pl.BlockSpec((Din, block_b), lambda i: (0, i)),   # x^T tile
                    const_spec((H1, Din)),                            # W1
                    const_spec((H1, 1)),                              # b1
                    const_spec((H2, H1)),                             # W2
                    const_spec((H2, 1)),                              # b2
                    const_spec((Dout, H1)),                           # W23 = W3 @ W2
                    const_spec((Dout, 1)),                            # b23 = W3 b2 + b3
                ],
                out_specs=(
                    pl.BlockSpec((Dout, block_b), lambda i: (0, i)),  # probs^T tile
                    pl.BlockSpec((H2, block_b), lambda i: (0, i)),    # x2^T tile
                ),
            ),
            compiler_params=pltpu.CompilerParams(
                dimension_semantics=("parallel",),            # batch tiles independent
                vmem_limit_bytes=32 * 1024 * 1024,            # explicit (v5e default is 16 MiB)
            ),
            cost_estimate=cost,
        )(xT, w1c, b1c, w2c, b2c, w23, b23c)

    try:
        probsT, x2T = call(True)
    except Exception:
        # TODO(synk): pl.Buffered(1) (single-buffered constant operands) not
        # accepted by this JAX version; fall back to default double-buffering.
        probsT, x2T = call(False)

    # Layout plumbing back to the module's (B, feature) convention.
    return probsT.T, x2T.T


def mlp_ref(x, w1, b1, w2, b2, w3, b3):
    """Pure-JAX reference matching the PyTorch eval-mode forward."""
    h1 = jax.nn.relu(x @ w1.T + b1)                             # dropout == identity
    x2 = h1 @ w2.T + b2
    logits = x2 @ w3.T + b3
    probs = jax.nn.softmax(logits, axis=1)
    return probs, x2


if __name__ == "__main__":
    # Small shapes consistent with the module: batch=16, input=16, h1=32,
    # h2=32, output=8.  block_b == B -> a single grid step (no split overhead).
    B, Din, H1, H2, Dout = 16, 16, 32, 32, 8

    key = jax.random.PRNGKey(0)
    kx, kw1, kb1, kw2, kb2, kw3, kb3 = jax.random.split(key, 7)

    # Deterministic synthetic parameters (PyTorch nn.Linear shapes: (out, in)).
    x = jax.random.normal(kx, (B, Din), dtype=jnp.float32)
    s1 = 1.0 / jnp.sqrt(jnp.float32(Din))
    w1 = jax.random.uniform(kw1, (H1, Din), jnp.float32, -s1, s1)
    b1 = jax.random.uniform(kb1, (H1,), jnp.float32, -s1, s1)
    s2 = 1.0 / jnp.sqrt(jnp.float32(H1))
    w2 = jax.random.uniform(kw2, (H2, H1), jnp.float32, -s2, s2)
    b2 = jax.random.uniform(kb2, (H2,), jnp.float32, -s2, s2)
    s3 = 1.0 / jnp.sqrt(jnp.float32(H2))
    w3 = jax.random.uniform(kw3, (Dout, H2), jnp.float32, -s3, s3)
    b3 = jax.random.uniform(kb3, (Dout,), jnp.float32, -s3, s3)

    probs, x2 = mlp_forward(x, w1, b1, w2, b2, w3, b3)
    probs, x2 = jax.block_until_ready((probs, x2))

    ref_probs, ref_x2 = mlp_ref(x, w1, b1, w2, b2, w3, b3)

    assert probs.shape == (B, Dout) and x2.shape == (B, H2)
    # Tolerances account for MXU f32 accumulation order, the fused (W3 W2)
    # logits path, and the approx-reciprocal (+Newton) softmax denominator.
    assert jnp.allclose(x2, ref_x2, atol=1e-4, rtol=1e-4), "x2 mismatch vs reference"
    assert jnp.allclose(probs, ref_probs, atol=1e-4, rtol=1e-4), "softmax mismatch vs reference"

    print("KERNEL_OK")
</pallas_src>

<mosaic_0001>
module attributes {stable_mosaic.version = 11 : i64} {
  func.func @_mlp_kernel(%arg0: i32, %arg1: memref<16x16xf32, #tpu.memory_space<vmem>>, %arg2: memref<32x16xf32, #tpu.memory_space<vmem>>, %arg3: memref<32x1xf32, #tpu.memory_space<vmem>>, %arg4: memref<32x32xf32, #tpu.memory_space<vmem>>, %arg5: memref<32x1xf32, #tpu.memory_space<vmem>>, %arg6: memref<8x32xf32, #tpu.memory_space<vmem>>, %arg7: memref<8x1xf32, #tpu.memory_space<vmem>>, %arg8: memref<8x16xf32, #tpu.memory_space<vmem>>, %arg9: memref<32x16xf32, #tpu.memory_space<vmem>>) attributes {dimension_semantics = [#tpu.dimension_semantics<parallel>], iteration_bounds = array<i64: 1>, scalar_prefetch = 0 : i64, scratch_operands = 0 : i64, tpu.core_type = #tpu.core_type<tc>, window_params = [{transform_indices = @transform_0, window_bounds = array<i64: 16, 16>}, {pipeline_mode = #tpu.pipeline_mode<synchronous>, transform_indices = @transform_1, window_bounds = array<i64: 32, 16>}, {pipeline_mode = #tpu.pipeline_mode<synchronous>, transform_indices = @transform_2, window_bounds = array<i64: 32, 1>}, {pipeline_mode = #tpu.pipeline_mode<synchronous>, transform_indices = @transform_3, window_bounds = array<i64: 32, 32>}, {pipeline_mode = #tpu.pipeline_mode<synchronous>, transform_indices = @transform_4, window_bounds = array<i64: 32, 1>}, {pipeline_mode = #tpu.pipeline_mode<synchronous>, transform_indices = @transform_5, window_bounds = array<i64: 8, 32>}, {pipeline_mode = #tpu.pipeline_mode<synchronous>, transform_indices = @transform_6, window_bounds = array<i64: 8, 1>}, {transform_indices = @transform_7, window_bounds = array<i64: 8, 16>}, {transform_indices = @transform_8, window_bounds = array<i64: 32, 16>}]} {
    %c0 = arith.constant 0 : index
    %c0_0 = arith.constant 0 : index
    %0 = vector.load %arg1[%c0, %c0_0] : memref<16x16xf32, #tpu.memory_space<vmem>>, vector<16x16xf32>
    %c0_1 = arith.constant 0 : index
    %c0_2 = arith.constant 0 : index
    %1 = vector.load %arg2[%c0_1, %c0_2] : memref<32x16xf32, #tpu.memory_space<vmem>>, vector<32x16xf32>
    %cst = arith.constant dense<0.000000e+00> : vector<32x16xf32>
    %2 = tpu.matmul %1, %0, %cst {dimension_numbers = #tpu.dot_dimension_numbers<[1], [0], [0], [1], [0, 0, 1, 1], [], []>} : vector<32x16xf32>, vector<16x16xf32>, vector<32x16xf32> -> vector<32x16xf32>
    %c0_3 = arith.constant 0 : index
    %c0_4 = arith.constant 0 : index
    %3 = vector.load %arg3[%c0_3, %c0_4] : memref<32x1xf32, #tpu.memory_space<vmem>>, vector<32x1xf32>
    %4 = vector.broadcast %3 : vector<32x1xf32> to vector<32x16xf32>
    %5 = arith.addf %2, %4 : vector<32x16xf32>
    %cst_5 = arith.constant 0.000000e+00 : f32
    %6 = vector.broadcast %cst_5 : f32 to vector<32x16xf32>
    %7 = arith.maximumf %5, %6 : vector<32x16xf32>
    %c0_6 = arith.constant 0 : index
    %c0_7 = arith.constant 0 : index
    %8 = vector.load %arg4[%c0_6, %c0_7] : memref<32x32xf32, #tpu.memory_space<vmem>>, vector<32x32xf32>
    %cst_8 = arith.constant dense<0.000000e+00> : vector<32x16xf32>
    %9 = tpu.matmul %8, %7, %cst_8 {dimension_numbers = #tpu.dot_dimension_numbers<[1], [0], [0], [1], [0, 0, 1, 1], [], []>} : vector<32x32xf32>, vector<32x16xf32>, vector<32x16xf32> -> vector<32x16xf32>
    %c0_9 = arith.constant 0 : index
    %c0_10 = arith.constant 0 : index
    %10 = vector.load %arg5[%c0_9, %c0_10] : memref<32x1xf32, #tpu.memory_space<vmem>>, vector<32x1xf32>
    %11 = vector.broadcast %10 : vector<32x1xf32> to vector<32x16xf32>
    %12 = arith.addf %9, %11 : vector<32x16xf32>
    %c0_11 = arith.constant 0 : index
    %c0_12 = arith.constant 0 : index
    %13 = vector.load %arg6[%c0_11, %c0_12] : memref<8x32xf32, #tpu.memory_space<vmem>>, vector<8x32xf32>
    %cst_13 = arith.constant dense<0.000000e+00> : vector<8x16xf32>
    %14 = tpu.matmul %13, %7, %cst_13 {dimension_numbers = #tpu.dot_dimension_numbers<[1], [0], [0], [1], [0, 0, 1, 1], [], []>} : vector<8x32xf32>, vector<32x16xf32>, vector<8x16xf32> -> vector<8x16xf32>
    %c0_14 = arith.constant 0 : index
    %c0_15 = arith.constant 0 : index
    %15 = vector.load %arg7[%c0_14, %c0_15] : memref<8x1xf32, #tpu.memory_space<vmem>>, vector<8x1xf32>
    %16 = vector.broadcast %15 : vector<8x1xf32> to vector<8x16xf32>
    %17 = arith.addf %14, %16 : vector<8x16xf32>
    %cst_16 = arith.constant dense<0xFF800000> : vector<16xf32>
    %18 = vector.multi_reduction <maximumf>, %17, %cst_16 [0] : vector<8x16xf32> to vector<16xf32>
    %19 = vector.shape_cast %18 : vector<16xf32> to vector<1x16xf32>
    %20 = vector.broadcast %19 : vector<1x16xf32> to vector<8x16xf32>
    %21 = arith.subf %17, %20 : vector<8x16xf32>
    %22 = math.exp %21 : vector<8x16xf32>
    %cst_17 = arith.constant dense<0.000000e+00> : vector<16xf32>
    %23 = vector.multi_reduction <add>, %22, %cst_17 [0] : vector<8x16xf32> to vector<16xf32>
    %24 = vector.shape_cast %23 : vector<16xf32> to vector<1x16xf32>
    %25 = tpu.reciprocal %24 {approx = true} : vector<1x16xf32> -> vector<1x16xf32>
    %26 = arith.mulf %24, %25 : vector<1x16xf32>
    %cst_18 = arith.constant 2.000000e+00 : f32
    %27 = vector.broadcast %cst_18 : f32 to vector<1x16xf32>
    %28 = arith.subf %27, %26 : vector<1x16xf32>
    %29 = arith.mulf %25, %28 : vector<1x16xf32>
    %30 = vector.broadcast %29 : vector<1x16xf32> to vector<8x16xf32>
    %31 = arith.mulf %22, %30 : vector<8x16xf32>
    %c0_19 = arith.constant 0 : index
    %c0_20 = arith.constant 0 : index
    %32 = vector.load %arg8[%c0_19, %c0_20] : memref<8x16xf32, #tpu.memory_space<vmem>>, vector<8x16xf32>
    tpu.vector_store %arg8[%c0_19, %c0_20], %31 {strides = array<i32>} : memref<8x16xf32, #tpu.memory_space<vmem>>, vector<8x16xf32>,
    %c0_21 = arith.constant 0 : index
    %c0_22 = arith.constant 0 : index
    %33 = vector.load %arg9[%c0_21, %c0_22] : memref<32x16xf32, #tpu.memory_space<vmem>>, vector<32x16xf32>
    tpu.vector_store %arg9[%c0_21, %c0_22], %12 {strides = array<i32>} : memref<32x16xf32, #tpu.memory_space<vmem>>, vector<32x16xf32>,
    return
  }
  func.func @transform_0(%arg0: i32) -> (i32, i32) {
    %c0_i32 = arith.constant 0 : i32
    %c0_i32_0 = arith.constant 0 : i32
    return %c0_i32, %arg0 : i32, i32
  }
  func.func @transform_1(%arg0: i32) -> (i32, i32) {
    %c0_i32 = arith.constant 0 : i32
    %c0_i32_0 = arith.constant 0 : i32
    %c0_i32_1 = arith.constant 0 : i32
    return %c0_i32, %c0_i32_0 : i32, i32
  }
  func.func @transform_2(%arg0: i32) -> (i32, i32) {
    %c0_i32 = arith.constant 0 : i32
    %c0_i32_0 = arith.constant 0 : i32
    %c0_i32_1 = arith.constant 0 : i32
    return %c0_i32, %c0_i32_0 : i32, i32
  }
  func.func @transform_3(%arg0: i32) -> (i32, i32) {
    %c0_i32 = arith.constant 0 : i32
    %c0_i32_0 = arith.constant 0 : i32
    %c0_i32_1 = arith.constant 0 : i32
    return %c0_i32, %c0_i32_0 : i32, i32
  }
  func.func @transform_4(%arg0: i32) -> (i32, i32) {
    %c0_i32 = arith.constant 0 : i32
    %c0_i32_0 = arith.constant 0 : i32
    %c0_i32_1 = arith.constant 0 : i32
    return %c0_i32, %c0_i32_0 : i32, i32
  }
  func.func @transform_5(%arg0: i32) -> (i32, i32) {
    %c0_i32 = arith.constant 0 : i32
    %c0_i32_0 = arith.constant 0 : i32
    %c0_i32_1 = arith.constant 0 : i32
    return %c0_i32, %c0_i32_0 : i32, i32
  }
  func.func @transform_6(%arg0: i32) -> (i32, i32) {
    %c0_i32 = arith.constant 0 : i32
    %c0_i32_0 = arith.constant 0 : i32
    %c0_i32_1 = arith.constant 0 : i32
    return %c0_i32, %c0_i32_0 : i32, i32
  }
  func.func @transform_7(%arg0: i32) -> (i32, i32) {
    %c0_i32 = arith.constant 0 : i32
    %c0_i32_0 = arith.constant 0 : i32
    return %c0_i32, %arg0 : i32, i32
  }
  func.func @transform_8(%arg0: i32) -> (i32, i32) {
    %c0_i32 = arith.constant 0 : i32
    %c0_i32_0 = arith.constant 0 : i32
    return %c0_i32, %arg0 : i32, i32
  }
}

module attributes {stable_mosaic.version = 11 : i64} {
  func.func @_mlp_kernel(%arg0: i32, %arg1: memref<16x16xf32, #tpu.memory_space<vmem>>, %arg2: memref<32x16xf32, #tpu.memory_space<vmem>>, %arg3: memref<32x1xf32, #tpu.memory_space<vmem>>, %arg4: memref<32x32xf32, #tpu.memory_space<vmem>>, %arg5: memref<32x1xf32, #tpu.memory_space<vmem>>, %arg6: memref<8x32xf32, #tpu.memory_space<vmem>>, %arg7: memref<8x1xf32, #tpu.memory_space<vmem>>, %arg8: memref<8x16xf32, #tpu.memory_space<vmem>>, %arg9: memref<32x16xf32, #tpu.memory_space<vmem>>) attributes {dimension_semantics = [#tpu.dimension_semantics<parallel>], iteration_bounds = array<i64: 1>, scalar_prefetch = 0 : i64, scratch_operands = 0 : i64, tpu.core_type = #tpu.core_type<tc>, window_params = [{transform_indices = @transform_0, window_bounds = array<i64: 16, 16>}, {pipeline_mode = #tpu.pipeline_mode<synchronous>, transform_indices = @transform_1, window_bounds = array<i64: 32, 16>}, {pipeline_mode = #tpu.pipeline_mode<synchronous>, transform_indices = @transform_2, window_bounds = array<i64: 32, 1>}, {pipeline_mode = #tpu.pipeline_mode<synchronous>, transform_indices = @transform_3, window_bounds = array<i64: 32, 32>}, {pipeline_mode = #tpu.pipeline_mode<synchronous>, transform_indices = @transform_4, window_bounds = array<i64: 32, 1>}, {pipeline_mode = #tpu.pipeline_mode<synchronous>, transform_indices = @transform_5, window_bounds = array<i64: 8, 32>}, {pipeline_mode = #tpu.pipeline_mode<synchronous>, transform_indices = @transform_6, window_bounds = array<i64: 8, 1>}, {transform_indices = @transform_7, window_bounds = array<i64: 8, 16>}, {transform_indices = @transform_8, window_bounds = array<i64: 32, 16>}]} {
    %c0 = arith.constant 0 : index
    %c0_0 = arith.constant 0 : index
    %0 = vector.load %arg1[%c0, %c0_0] : memref<16x16xf32, #tpu.memory_space<vmem>>, vector<16x16xf32>
    %c0_1 = arith.constant 0 : index
    %c0_2 = arith.constant 0 : index
    %1 = vector.load %arg2[%c0_1, %c0_2] : memref<32x16xf32, #tpu.memory_space<vmem>>, vector<32x16xf32>
    %cst = arith.constant dense<0.000000e+00> : vector<32x16xf32>
    %2 = tpu.matmul %1, %0, %cst {dimension_numbers = #tpu.dot_dimension_numbers<[1], [0], [0], [1], [0, 0, 1, 1], [], []>} : vector<32x16xf32>, vector<16x16xf32>, vector<32x16xf32> -> vector<32x16xf32>
    %c0_3 = arith.constant 0 : index
    %c0_4 = arith.constant 0 : index
    %3 = vector.load %arg3[%c0_3, %c0_4] : memref<32x1xf32, #tpu.memory_space<vmem>>, vector<32x1xf32>
    %4 = vector.broadcast %3 : vector<32x1xf32> to vector<32x16xf32>
    %5 = arith.addf %2, %4 : vector<32x16xf32>
    %cst_5 = arith.constant 0.000000e+00 : f32
    %6 = vector.broadcast %cst_5 : f32 to vector<32x16xf32>
    %7 = arith.maximumf %5, %6 : vector<32x16xf32>
    %c0_6 = arith.constant 0 : index
    %c0_7 = arith.constant 0 : index
    %8 = vector.load %arg4[%c0_6, %c0_7] : memref<32x32xf32, #tpu.memory_space<vmem>>, vector<32x32xf32>
    %cst_8 = arith.constant dense<0.000000e+00> : vector<32x16xf32>
    %9 = tpu.matmul %8, %7, %cst_8 {dimension_numbers = #tpu.dot_dimension_numbers<[1], [0], [0], [1], [0, 0, 1, 1], [], []>} : vector<32x32xf32>, vector<32x16xf32>, vector<32x16xf32> -> vector<32x16xf32>
    %c0_9 = arith.constant 0 : index
    %c0_10 = arith.constant 0 : index
    %10 = vector.load %arg5[%c0_9, %c0_10] : memref<32x1xf32, #tpu.memory_space<vmem>>, vector<32x1xf32>
    %11 = vector.broadcast %10 : vector<32x1xf32> to vector<32x16xf32>
    %12 = arith.addf %9, %11 : vector<32x16xf32>
    %c0_11 = arith.constant 0 : index
    %c0_12 = arith.constant 0 : index
    %13 = vector.load %arg6[%c0_11, %c0_12] : memref<8x32xf32, #tpu.memory_space<vmem>>, vector<8x32xf32>
    %cst_13 = arith.constant dense<0.000000e+00> : vector<8x16xf32>
    %14 = tpu.matmul %13, %7, %cst_13 {dimension_numbers = #tpu.dot_dimension_numbers<[1], [0], [0], [1], [0, 0, 1, 1], [], []>} : vector<8x32xf32>, vector<32x16xf32>, vector<8x16xf32> -> vector<8x16xf32>
    %c0_14 = arith.constant 0 : index
    %c0_15 = arith.constant 0 : index
    %15 = vector.load %arg7[%c0_14, %c0_15] : memref<8x1xf32, #tpu.memory_space<vmem>>, vector<8x1xf32>
    %16 = vector.broadcast %15 : vector<8x1xf32> to vector<8x16xf32>
    %17 = arith.addf %14, %16 : vector<8x16xf32>
    %cst_16 = arith.constant dense<0xFF800000> : vector<16xf32>
    %18 = vector.multi_reduction <maximumf>, %17, %cst_16 [0] : vector<8x16xf32> to vector<16xf32>
    %19 = vector.shape_cast %18 : vector<16xf32> to vector<1x16xf32>
    %20 = vector.broadcast %19 : vector<1x16xf32> to vector<8x16xf32>
    %21 = arith.subf %17, %20 : vector<8x16xf32>
    %22 = math.exp %21 : vector<8x16xf32>
    %cst_17 = arith.constant dense<0.000000e+00> : vector<16xf32>
    %23 = vector.multi_reduction <add>, %22, %cst_17 [0] : vector<8x16xf32> to vector<16xf32>
    %24 = vector.shape_cast %23 : vector<16xf32> to vector<1x16xf32>
    %25 = tpu.reciprocal %24 {approx = true} : vector<1x16xf32> -> vector<1x16xf32>
    %26 = arith.mulf %24, %25 : vector<1x16xf32>
    %cst_18 = arith.constant 2.000000e+00 : f32
    %27 = vector.broadcast %cst_18 : f32 to vector<1x16xf32>
    %28 = arith.subf %27, %26 : vector<1x16xf32>
    %29 = arith.mulf %25, %28 : vector<1x16xf32>
    %30 = vector.broadcast %29 : vector<1x16xf32> to vector<8x16xf32>
    %31 = arith.mulf %22, %30 : vector<8x16xf32>
    %c0_19 = arith.constant 0 : index
    %c0_20 = arith.constant 0 : index
    %32 = vector.load %arg8[%c0_19, %c0_20] : memref<8x16xf32, #tpu.memory_space<vmem>>, vector<8x16xf32>
    tpu.vector_store %arg8[%c0_19, %c0_20], %31 {strides = array<i32>} : memref<8x16xf32, #tpu.memory_space<vmem>>, vector<8x16xf32>,
    %c0_21 = arith.constant 0 : index
    %c0_22 = arith.constant 0 : index
    %33 = vector.load %arg9[%c0_21, %c0_22] : memref<32x16xf32, #tpu.memory_space<vmem>>, vector<32x16xf32>
    tpu.vector_store %arg9[%c0_21, %c0_22], %12 {strides = array<i32>} : memref<32x16xf32, #tpu.memory_space<vmem>>, vector<32x16xf32>,
    return
  }
  func.func @transform_0(%arg0: i32) -> (i32, i32) {
    %c0_i32 = arith.constant 0 : i32
    %c0_i32_0 = arith.constant 0 : i32
    return %c0_i32, %arg0 : i32, i32
  }
  func.func @transform_1(%arg0: i32) -> (i32, i32) {
    %c0_i32 = arith.constant 0 : i32
    %c0_i32_0 = arith.constant 0 : i32
    %c0_i32_1 = arith.constant 0 : i32
    return %c0_i32, %c0_i32_0 : i32, i32
  }
  func.func @transform_2(%arg0: i32) -> (i32, i32) {
    %c0_i32 = arith.constant 0 : i32
    %c0_i32_0 = arith.constant 0 : i32
    %c0_i32_1 = arith.constant 0 : i32
    return %c0_i32, %c0_i32_0 : i32, i32
  }
  func.func @transform_3(%arg0: i32) -> (i32, i32) {
    %c0_i32 = arith.constant 0 : i32
    %c0_i32_0 = arith.constant 0 : i32
    %c0_i32_1 = arith.constant 0 : i32
    return %c0_i32, %c0_i32_0 : i32, i32
  }
  func.func @transform_4(%arg0: i32) -> (i32, i32) {
    %c0_i32 = arith.constant 0 : i32
    %c0_i32_0 = arith.constant 0 : i32
    %c0_i32_1 = arith.constant 0 : i32
    return %c0_i32, %c0_i32_0 : i32, i32
  }
  func.func @transform_5(%arg0: i32) -> (i32, i32) {
    %c0_i32 = arith.constant 0 : i32
    %c0_i32_0 = arith.constant 0 : i32
    %c0_i32_1 = arith.constant 0 : i32
    return %c0_i32, %c0_i32_0 : i32, i32
  }
  func.func @transform_6(%arg0: i32) -> (i32, i32) {
    %c0_i32 = arith.constant 0 : i32
    %c0_i32_0 = arith.constant 0 : i32
    %c0_i32_1 = arith.constant 0 : i32
    return %c0_i32, %c0_i32_0 : i32, i32
  }
  func.func @transform_7(%arg0: i32) -> (i32, i32) {
    %c0_i32 = arith.constant 0 : i32
    %c0_i32_0 = arith.constant 0 : i32
    return %c0_i32, %arg0 : i32, i32
  }
  func.func @transform_8(%arg0: i32) -> (i32, i32) {
    %c0_i32 = arith.constant 0 : i32
    %c0_i32_0 = arith.constant 0 : i32
    return %c0_i32, %arg0 : i32, i32
  }
}

</mosaic_0001>

<bundles_post_ra>
// kernel: tpu_custom_call.1
= control target key start
LH: loop header
LB: loop body
LE: loop exit
PB: predicated region body
PF: predicated region fallthrough
CT: control target
= control target key end

     0   :  { %vm59_vm0 = vcmask 130048   ;;  %v528_v4 = vmov 0   ;;  %s678_s0 = inlined_call_operand.vmem [shape: f32[16,16], index: 0, kind: input, shape index: {}]   ;;  %s679_s1 = inlined_call_operand.vmem [shape: f32[32,16], index: 1, kind: input, shape index: {}]   ;;  %s680_s2 = inlined_call_operand.vmem [shape: f32[32,1], index: 2, kind: input, shape index: {}]   ;;  %s681_s3 = inlined_call_operand.vmem [shape: f32[32,32], index: 3, kind: input, shape index: {}]   ;;  %s682_s4 = inlined_call_operand.vmem [shape: f32[32,1], index: 4, kind: input, shape index: {}]   ;;  %s683_s5 = inlined_call_operand.vmem [shape: f32[8,32], index: 5, kind: input, shape index: {}]   ;;  %s684_s6 = inlined_call_operand.vmem [shape: f32[8,1], index: 6, kind: input, shape index: {}]   ;;  %s685_s7 = inlined_call_operand.hbm [shape: f32[8,16], index: 7, kind: output, shape index: {0}]   ;;  %s686_s8 = inlined_call_operand.vmem [shape: f32[32,16], index: 8, kind: output, shape index: {1}]  }
   0x1   :  { %v29_v0 = vld [vmem:[%s678_s0] sm:$0xff]  ;;  %v30_v1 = vld [vmem:[%s678_s0 + $0x8] sm:$0xff]  ;;  %498 = vset.pattern.permute.xlu0 %v528_v4  ;;  %499 = vset.pattern.permute.xlu1 %v528_v4  ;;  %v37_v6 = vld [vmem:[%s680_s2 + $0x10] sm:$0xff] }
   0x2   :  { %v31_v2 = vld [vmem:[%s679_s1] sm:$0xff]  ;;  %v475_v3 = vpack.c.bf16 %v30_v1, %v29_v0  ;;  %v32_v7 = vld [vmem:[%s679_s1 + $0x8] sm:$0xff]  ;;  %51 = vperm.xlu1 %499, %v37_v6   ;;  %v33_v9 = vld [vmem:[%s679_s1 + $0x10] sm:$0xff] }
   0x3   :  { %444 = vmatprep.mubr.msk.f32.mxu0 %vm59_vm0, %v31_v2  ;;  %v35_v5 = vld [vmem:[%s680_s2] sm:$0xff]  ;;  %v36_v8 = vld [vmem:[%s680_s2 + $0x8] sm:$0xff]  ;;  %v38_v10 = vld [vmem:[%s680_s2 + $0x18] sm:$0xff] }
   0x4   :  { %476 = vmatprep.subr.bf16.mxu0 %v475_v3  ;;  %41 = vperm.xlu0 %498, %v35_v5  }
   0x5   :  { %478 = vmatpush3.bf16.msra.mxu0 %v475_v3 }
   0x6   :  { %14 = vsyncpa [#allocation3], 0  ;;  %v34_v11 = vld [vmem:[%s679_s1 + $0x18] sm:$0xff]  ;;  %v288_v12 = vld [vmem:[%s684_s6] sm:$0xff]  ;;  %56 = vperm.xlu1 %499, %v38_v10   ;;  %v529_v17 = vmov 0.0|0.0   ;;  %vm189_vm1 = vcmask 261120  }
   0x7   :  { %v165_v13 = vld [vmem:[%s682_s4] sm:$0xff]  ;;  %v166_v14 = vld [vmem:[%s682_s4 + $0x8] sm:$0xff]  ;;  %v167_v15 = vld [vmem:[%s682_s4 + $0x10] sm:$0xff]  ;;  %487 = vmatprep.subr.bf16.mxu0 %v529_v17  ;;  %vm530_vm2 = vmmov 0   ;;  %v531_v19 = vmov 0.0  }
   0x8   :  { %445 = vmatmul.mubr.msk.f32.vlgmr.msra.gmra.mrb[0].mxu0 %vm59_vm0, %v32_v7  ;;  %46 = vperm.xlu0 %498, %v36_v8   ;;  %v168_v16 = vld [vmem:[%s682_s4 + $0x18] sm:$0xff]  ;;  %v161_v18 = vld [vmem:[%s681_s3] sm:$0xff]  ;;  %v162_v39 = vld [vmem:[%s681_s3 + $0x8] sm:$0xff] }
   0x9   :  { %447 = vmatprep.mubr.msk.f32.mxu0 %vm59_vm0, %v33_v9  ;;  %458 = vmatprep.mubr.msk.f32.mxu1 %vm189_vm1, %v161_v18  ;;  %v287_v38 = vld [vmem:[%s683_s5] sm:$0xff]  ;;  %v163_v40 = vld [vmem:[%s681_s3 + $0x10] sm:$0xff]  ;;  %v164_v41 = vld [vmem:[%s681_s3 + $0x18] sm:$0xff] }
   0xa   :  { %171 = vperm.xlu1 %499, %v165_v13  }
   0xc   :  { %448 = vmatmul.mubr.msk.f32.gmra.mrb[2].mxu0 %vm59_vm0, %v34_v11  ;;  %291 = vperm.xlu0 %498, %v288_v12  }
   0xd   :  { %472 = vmatprep.mubr.msk.f32.mxu0 %vm530_vm2, %v531_v19 }
   0xe   :  { %181 = vperm.xlu1 %499, %v167_v15  }
  0x10   :  { %176 = vperm.xlu0 %498, %v166_v14  }
  0x14   :  { %186 = vperm.xlu0 %498, %v168_v16  }
  0x81   :  { %v52_v21 = vpop.permute.xlu1 %51 }
  0x83   :  { %v42_v20 = vpop.permute.xlu0 %41 }
  0x85   :  { %v57_v28 = vpop.permute.xlu1 %56 }
  0x87   :  { %v47_v22 = vpop.permute.xlu0 %46 }
  0x89   :  { %v172_v44 = vpop.permute.xlu1 %171 }
  0x8b   :  { %v292_v42 = vpop.permute.xlu0 %291 }
  0x8d   :  { %v182_v56 = vpop.permute.xlu1 %181 }
  0x8f   :  { %v177_v43 = vpop.permute.xlu0 %176 }
  0x93   :  { %v187_v54 = vpop.permute.xlu0 %186 }
  0xdb   :  { %v446_v23 = vpop.f32.mrb[0].mxu0 }
  0xdc   :  { %v144_v24 = vadd.f32 %v446_v23, %v47_v22  ;;  %v138_v25 = vpop.f32.mrb[1].mxu0 }
  0xdd   :  { %v139_v26 = vadd.f32 %v138_v25, %v42_v20 }
  0xde   :  { %v158_v27 = vmax.f32 %v144_v24, 0.0 }
  0xdf   :  { %v157_v29 = vmax.f32 %v139_v26, 0.0  ;;  %v449_v30 = vpop.f32.mrb[2].mxu0 }
  0xe0   :  { %v154_v31 = vadd.f32 %v449_v30, %v57_v28  ;;  %v148_v32 = vpop.f32.mrb[3].mxu0 }
  0xe1   :  { %v479_v33 = vpack.c.bf16 %v158_v27, %v157_v29  ;;  %v149_v34 = vadd.f32 %v148_v32, %v52_v21 }
  0xe2   :  { %v160_v35 = vmax.f32 %v154_v31, 0.0 }
  0xe3   :  { %v159_v36 = vmax.f32 %v149_v34, 0.0  ;;  %480 = vmatprep.subr.bf16.mxu1 %v479_v33  ;;  %489 = vmatpush3.bf16.msra.mxu0 %v479_v33 }
  0xe4   :  { %482 = vmatpush3.bf16.msra.mxu1 %v479_v33  ;;  %490 = vmatprep.subr.bf16.mxu0 %v529_v17 }
  0xe5   :  { %v483_v37 = vpack.c.bf16 %v160_v35, %v159_v36 }
  0xe7   :  { %484 = vmatprep.subr.bf16.mxu1 %v483_v37  ;;  %492 = vmatpush3.bf16.msra.mxu0 %v483_v37 }
  0xe8   :  { %486 = vmatpush3.bf16.msra.mxu1 %v483_v37 }
  0xea   :  { %473 = vmatmul.mubr.msk.f32.vlgmr.msra.gmra.mrb[4].mxu0 %vm189_vm1, %v287_v38 }
  0xeb   :  { %459 = vmatmul.mubr.msk.f32.vlgmr.msra.gmra.mrb[0].mxu1 %vm189_vm1, %v162_v39 }
  0xec   :  { %461 = vmatprep.mubr.msk.f32.mxu1 %vm189_vm1, %v163_v40 }
  0xef   :  { %462 = vmatmul.mubr.msk.f32.gmra.mrb[2].mxu1 %vm189_vm1, %v164_v41 }
 0x1bd   :  { %v363_v45 = vpop.f32.mrb[4].mxu0 }
 0x1be   :  { %v364_v46 = vadd.f32 %v363_v45, %v292_v42  ;;  %v460_v47 = vpop.f32.mrb[0].mxu1  ;;  %v474_v48 = vpop.f32.mrb[5].mxu0 }
 0x1bf   :  { %v274_v49 = vadd.f32 %v460_v47, %v177_v43  ;;  %v268_v50 = vpop.f32.mrb[1].mxu1 }
 0x1c0   :  { %v367_v51 = vsel %vm59_vm0, %v364_v46, -inf  ;;  %v269_v52 = vadd.f32 %v268_v50, %v172_v44 }
 0x1c1   :  { %v368_v53 = vrot.slane %v367_v51, 4  ;;  %391 = vst.msk [vmem:[%s686_s8 + $0x8] sm:$0xff] %vm59_vm0, %v274_v49 }
 0x1c2   :  { %390 = vst.msk [vmem:[%s686_s8] sm:$0xff] %vm59_vm0, %v269_v52  ;;  %v463_v55 = vpop.f32.mrb[2].mxu1 }
 0x1c3   :  { %v369_v57 = vmax.f32 %v367_v51, %v368_v53  ;;  %v284_v58 = vadd.f32 %v463_v55, %v187_v54  ;;  %v278_v59 = vpop.f32.mrb[3].mxu1 }
 0x1c4   :  { %v279_v60 = vadd.f32 %v278_v59, %v182_v56 }
 0x1c5   :  { %v370_v61 = vrot.slane %v369_v57, 2  ;;  %393 = vst.msk [vmem:[%s686_s8 + $0x18] sm:$0xff] %vm59_vm0, %v284_v58 }
 0x1c6   :  { %392 = vst.msk [vmem:[%s686_s8 + $0x10] sm:$0xff] %vm59_vm0, %v279_v60  ;;  %s532_s8 = smov [#allocation2]  }
 0x1c7   :  { %v371_v62 = vmax.f32 %v369_v57, %v370_v61  ;;  %s400_s23 = sshll.u32 %s532_s8, 4  ;;  %s401_s23 = int_to_ptr.vmem [resolvable:$true] %s400_s23 }
 0x1c8   :  { %s504_s24 = scalar_lea.vmem %s401_s23, 128  ;;  %p509_p1 = scmp.lt.s32.totalorder %s401_s23, %s401_s23 }
 0x1c9   :  { %v372_v63 = vrot.slane %v371_v62, 1  ;;  %p505_p0 = scmp.ne.s32.totalorder %s401_s23, %s504_s24  ;;  %p510_p2 = scmp.lt.s32.totalorder %s504_s24, %s504_s24 }
 0x1cb   :  { %v373_v0 = vmax.f32 %v371_v62, %v372_v63  ;;  %p511_p3 = por %p510_p2, %p509_p1 }
 0x1cd   :  { %v374_v1 = vsub.f32 %v364_v46, %v373_v0  ;;  %p512_p4 = pnand %p511_p3, %p505_p0 }
 0x1cf   :  { %v375_v2 = vmul.f32 1.442695, %v374_v1 }
 0x1d1   :  { %500 = vpow2.f32 %v375_v2 }
 0x1db   :  { %v501_v3 = vpop.eup %500 }
 0x1dc   :  { %v377_v4 = vsel %vm59_vm0, %v501_v3, 0.0 }
 0x1dd   :  { %v378_v5 = vrot.slane %v377_v4, 4 }
 0x1df   :  { %v379_v6 = vadd.f32 %v378_v5, %v377_v4 }
 0x1e1   :  { %v380_v7 = vrot.slane %v379_v6, 2 }
 0x1e3   :  { %v381_v8 = vadd.f32 %v380_v7, %v379_v6 }
 0x1e5   :  { %v382_v9 = vrot.slane %v381_v8, 1 }
 0x1e7   :  { %v383_v10 = vadd.f32 %v382_v9, %v381_v8 }
 0x1e9   :  { %502 = vrcp.f32 %v383_v10 }
 0x1f3   :  { %v503_v11 = vpop.eup %502 }
 0x1f4   :  { %v385_v12 = vmul.f32 %v503_v11, %v383_v10 }
 0x1f6   :  { %v386_v13 = vsub.f32 2.0, %v385_v12 }
 0x1f8   :  { %v387_v14 = vmul.f32 %v503_v11, %v386_v13 }
 0x1fa   :  { %v388_v15 = vmul.f32 %v501_v3, %v387_v14 }
 0x1fc   :  { %389 = vst.msk [vmem:[#allocation2] sm:$0xff] %vm59_vm0, %v388_v15 }
 0x1fd   :  { %515 = shalt.err (!%p512_p4)
}
 0x1fe   :  { %s516_s27 = scalar_lea.hbm %s685_s7, 128 }
 0x1ff   :  { %p517_p5 = scmp.ne.s32.totalorder %s685_s7, %s516_s27  ;;  %p520_p6 = scmp.lt.u32.totalorder %s516_s27, %s685_s7 }
 0x201   :  { %p522_p7 = pnand %p520_p6, %p517_p5 }
 0x203   :  { %525 = shalt.err (!%p522_p7)
}
 0x204   :  { %403 = dma.vmem_to_hbm [thread:$0]  %s401_s23, 128, %s685_s7, [#allocation3]  }
 0x205   :  { %526 = dma.done.wait [#allocation3], 128  }
 0x206   :  { %527 = vsyncadd [#allocation3], 4294967168 }
 0x207   :  { %411 = vsyncpa [#allocation3], 1 }

// kernel: tpu_custom_call.1
= control target key start
LH: loop header
LB: loop body
LE: loop exit
PB: predicated region body
PF: predicated region fallthrough
CT: control target
= control target key end

     0   :  { %vm59_vm0 = vcmask 130048   ;;  %v528_v4 = vmov 0   ;;  %s678_s0 = inlined_call_operand.vmem [shape: f32[16,16], index: 0, kind: input, shape index: {}]   ;;  %s679_s1 = inlined_call_operand.vmem [shape: f32[32,16], index: 1, kind: input, shape index: {}]   ;;  %s680_s2 = inlined_call_operand.vmem [shape: f32[32,1], index: 2, kind: input, shape index: {}]   ;;  %s681_s3 = inlined_call_operand.vmem [shape: f32[32,32], index: 3, kind: input, shape index: {}]   ;;  %s682_s4 = inlined_call_operand.vmem [shape: f32[32,1], index: 4, kind: input, shape index: {}]   ;;  %s683_s5 = inlined_call_operand.vmem [shape: f32[8,32], index: 5, kind: input, shape index: {}]   ;;  %s684_s6 = inlined_call_operand.vmem [shape: f32[8,1], index: 6, kind: input, shape index: {}]   ;;  %s685_s7 = inlined_call_operand.hbm [shape: f32[8,16], index: 7, kind: output, shape index: {0}]   ;;  %s686_s8 = inlined_call_operand.vmem [shape: f32[32,16], index: 8, kind: output, shape index: {1}]  }
   0x1   :  { %v29_v0 = vld [vmem:[%s678_s0] sm:$0xff]  ;;  %v30_v1 = vld [vmem:[%s678_s0 + $0x8] sm:$0xff]  ;;  %498 = vset.pattern.permute.xlu0 %v528_v4  ;;  %499 = vset.pattern.permute.xlu1 %v528_v4  ;;  %v37_v6 = vld [vmem:[%s680_s2 + $0x10] sm:$0xff] }
   0x2   :  { %v31_v2 = vld [vmem:[%s679_s1] sm:$0xff]  ;;  %v475_v3 = vpack.c.bf16 %v30_v1, %v29_v0  ;;  %v32_v7 = vld [vmem:[%s679_s1 + $0x8] sm:$0xff]  ;;  %51 = vperm.xlu1 %499, %v37_v6   ;;  %v33_v9 = vld [vmem:[%s679_s1 + $0x10] sm:$0xff] }
   0x3   :  { %444 = vmatprep.mubr.msk.f32.mxu0 %vm59_vm0, %v31_v2  ;;  %v35_v5 = vld [vmem:[%s680_s2] sm:$0xff]  ;;  %v36_v8 = vld [vmem:[%s680_s2 + $0x8] sm:$0xff]  ;;  %v38_v10 = vld [vmem:[%s680_s2 + $0x18] sm:$0xff] }
   0x4   :  { %476 = vmatprep.subr.bf16.mxu0 %v475_v3  ;;  %41 = vperm.xlu0 %498, %v35_v5  }
   0x5   :  { %478 = vmatpush3.bf16.msra.mxu0 %v475_v3 }
   0x6   :  { %14 = vsyncpa [#allocation3], 0  ;;  %v34_v11 = vld [vmem:[%s679_s1 + $0x18] sm:$0xff]  ;;  %v288_v12 = vld [vmem:[%s684_s6] sm:$0xff]  ;;  %56 = vperm.xlu1 %499, %v38_v10   ;;  %v529_v17 = vmov 0.0|0.0   ;;  %vm189_vm1 = vcmask 261120  }
   0x7   :  { %v165_v13 = vld [vmem:[%s682_s4] sm:$0xff]  ;;  %v166_v14 = vld [vmem:[%s682_s4 + $0x8] sm:$0xff]  ;;  %v167_v15 = vld [vmem:[%s682_s4 + $0x10] sm:$0xff]  ;;  %487 = vmatprep.subr.bf16.mxu0 %v529_v17  ;;  %vm530_vm2 = vmmov 0   ;;  %v531_v19 = vmov 0.0  }
   0x8   :  { %445 = vmatmul.mubr.msk.f32.vlgmr.msra.gmra.mrb[0].mxu0 %vm59_vm0, %v32_v7  ;;  %46 = vperm.xlu0 %498, %v36_v8   ;;  %v168_v16 = vld [vmem:[%s682_s4 + $0x18] sm:$0xff]  ;;  %v161_v18 = vld [vmem:[%s681_s3] sm:$0xff]  ;;  %v162_v39 = vld [vmem:[%s681_s3 + $0x8] sm:$0xff] }
   0x9   :  { %447 = vmatprep.mubr.msk.f32.mxu0 %vm59_vm0, %v33_v9  ;;  %458 = vmatprep.mubr.msk.f32.mxu1 %vm189_vm1, %v161_v18  ;;  %v287_v38 = vld [vmem:[%s683_s5] sm:$0xff]  ;;  %v163_v40 = vld [vmem:[%s681_s3 + $0x10] sm:$0xff]  ;;  %v164_v41 = vld [vmem:[%s681_s3 + $0x18] sm:$0xff] }
   0xa   :  { %171 = vperm.xlu1 %499, %v165_v13  }
   0xc   :  { %448 = vmatmul.mubr.msk.f32.gmra.mrb[2].mxu0 %vm59_vm0, %v34_v11  ;;  %291 = vperm.xlu0 %498, %v288_v12  }
   0xd   :  { %472 = vmatprep.mubr.msk.f32.mxu0 %vm530_vm2, %v531_v19 }
   0xe   :  { %181 = vperm.xlu1 %499, %v167_v15  }
  0x10   :  { %176 = vperm.xlu0 %498, %v166_v14  }
  0x14   :  { %186 = vperm.xlu0 %498, %v168_v16  }
  0x81   :  { %v52_v21 = vpop.permute.xlu1 %51 }
  0x83   :  { %v42_v20 = vpop.permute.xlu0 %41 }
  0x85   :  { %v57_v28 = vpop.permute.xlu1 %56 }
  0x87   :  { %v47_v22 = vpop.permute.xlu0 %46 }
  0x89   :  { %v172_v44 = vpop.permute.xlu1 %171 }
  0x8b   :  { %v292_v42 = vpop.permute.xlu0 %291 }
  0x8d   :  { %v182_v56 = vpop.permute.xlu1 %181 }
  0x8f   :  { %v177_v43 = vpop.permute.xlu0 %176 }
  0x93   :  { %v187_v54 = vpop.permute.xlu0 %186 }
  0xdb   :  { %v446_v23 = vpop.f32.mrb[0].mxu0 }
  0xdc   :  { %v144_v24 = vadd.f32 %v446_v23, %v47_v22  ;;  %v138_v25 = vpop.f32.mrb[1].mxu0 }
  0xdd   :  { %v139_v26 = vadd.f32 %v138_v25, %v42_v20 }
  0xde   :  { %v158_v27 = vmax.f32 %v144_v24, 0.0 }
  0xdf   :  { %v157_v29 = vmax.f32 %v139_v26, 0.0  ;;  %v449_v30 = vpop.f32.mrb[2].mxu0 }
  0xe0   :  { %v154_v31 = vadd.f32 %v449_v30, %v57_v28  ;;  %v148_v32 = vpop.f32.mrb[3].mxu0 }
  0xe1   :  { %v479_v33 = vpack.c.bf16 %v158_v27, %v157_v29  ;;  %v149_v34 = vadd.f32 %v148_v32, %v52_v21 }
  0xe2   :  { %v160_v35 = vmax.f32 %v154_v31, 0.0 }
  0xe3   :  { %v159_v36 = vmax.f32 %v149_v34, 0.0  ;;  %480 = vmatprep.subr.bf16.mxu1 %v479_v33  ;;  %489 = vmatpush3.bf16.msra.mxu0 %v479_v33 }
  0xe4   :  { %482 = vmatpush3.bf16.msra.mxu1 %v479_v33  ;;  %490 = vmatprep.subr.bf16.mxu0 %v529_v17 }
  0xe5   :  { %v483_v37 = vpack.c.bf16 %v160_v35, %v159_v36 }
  0xe7   :  { %484 = vmatprep.subr.bf16.mxu1 %v483_v37  ;;  %492 = vmatpush3.bf16.msra.mxu0 %v483_v37 }
  0xe8   :  { %486 = vmatpush3.bf16.msra.mxu1 %v483_v37 }
  0xea   :  { %473 = vmatmul.mubr.msk.f32.vlgmr.msra.gmra.mrb[4].mxu0 %vm189_vm1, %v287_v38 }
  0xeb   :  { %459 = vmatmul.mubr.msk.f32.vlgmr.msra.gmra.mrb[0].mxu1 %vm189_vm1, %v162_v39 }
  0xec   :  { %461 = vmatprep.mubr.msk.f32.mxu1 %vm189_vm1, %v163_v40 }
  0xef   :  { %462 = vmatmul.mubr.msk.f32.gmra.mrb[2].mxu1 %vm189_vm1, %v164_v41 }
 0x1bd   :  { %v363_v45 = vpop.f32.mrb[4].mxu0 }
 0x1be   :  { %v364_v46 = vadd.f32 %v363_v45, %v292_v42  ;;  %v460_v47 = vpop.f32.mrb[0].mxu1  ;;  %v474_v48 = vpop.f32.mrb[5].mxu0 }
 0x1bf   :  { %v274_v49 = vadd.f32 %v460_v47, %v177_v43  ;;  %v268_v50 = vpop.f32.mrb[1].mxu1 }
 0x1c0   :  { %v367_v51 = vsel %vm59_vm0, %v364_v46, -inf  ;;  %v269_v52 = vadd.f32 %v268_v50, %v172_v44 }
 0x1c1   :  { %v368_v53 = vrot.slane %v367_v51, 4  ;;  %391 = vst.msk [vmem:[%s686_s8 + $0x8] sm:$0xff] %vm59_vm0, %v274_v49 }
 0x1c2   :  { %390 = vst.msk [vmem:[%s686_s8] sm:$0xff] %vm59_vm0, %v269_v52  ;;  %v463_v55 = vpop.f32.mrb[2].mxu1 }
 0x1c3   :  { %v369_v57 = vmax.f32 %v367_v51, %v368_v53  ;;  %v284_v58 = vadd.f32 %v463_v55, %v187_v54  ;;  %v278_v59 = vpop.f32.mrb[3].mxu1 }
 0x1c4   :  { %v279_v60 = vadd.f32 %v278_v59, %v182_v56 }
 0x1c5   :  { %v370_v61 = vrot.slane %v369_v57, 2  ;;  %393 = vst.msk [vmem:[%s686_s8 + $0x18] sm:$0xff] %vm59_vm0, %v284_v58 }
 0x1c6   :  { %392 = vst.msk [vmem:[%s686_s8 + $0x10] sm:$0xff] %vm59_vm0, %v279_v60  ;;  %s532_s8 = smov [#allocation2]  }
 0x1c7   :  { %v371_v62 = vmax.f32 %v369_v57, %v370_v61  ;;  %s400_s23 = sshll.u32 %s532_s8, 4  ;;  %s401_s23 = int_to_ptr.vmem [resolvable:$true] %s400_s23 }
 0x1c8   :  { %s504_s24 = scalar_lea.vmem %s401_s23, 128  ;;  %p509_p1 = scmp.lt.s32.totalorder %s401_s23, %s401_s23 }
 0x1c9   :  { %v372_v63 = vrot.slane %v371_v62, 1  ;;  %p505_p0 = scmp.ne.s32.totalorder %s401_s23, %s504_s24  ;;  %p510_p2 = scmp.lt.s32.totalorder %s504_s24, %s504_s24 }
 0x1cb   :  { %v373_v0 = vmax.f32 %v371_v62, %v372_v63  ;;  %p511_p3 = por %p510_p2, %p509_p1 }
 0x1cd   :  { %v374_v1 = vsub.f32 %v364_v46, %v373_v0  ;;  %p512_p4 = pnand %p511_p3, %p505_p0 }
 0x1cf   :  { %v375_v2 = vmul.f32 1.442695, %v374_v1 }
 0x1d1   :  { %500 = vpow2.f32 %v375_v2 }
 0x1db   :  { %v501_v3 = vpop.eup %500 }
 0x1dc   :  { %v377_v4 = vsel %vm59_vm0, %v501_v3, 0.0 }
 0x1dd   :  { %v378_v5 = vrot.slane %v377_v4, 4 }
 0x1df   :  { %v379_v6 = vadd.f32 %v378_v5, %v377_v4 }
 0x1e1   :  { %v380_v7 = vrot.slane %v379_v6, 2 }
 0x1e3   :  { %v381_v8 = vadd.f32 %v380_v7, %v379_v6 }
 0x1e5   :  { %v382_v9 = vrot.slane %v381_v8, 1 }
 0x1e7   :  { %v383_v10 = vadd.f32 %v382_v9, %v381_v8 }
 0x1e9   :  { %502 = vrcp.f32 %v383_v10 }
 0x1f3   :  { %v503_v11 = vpop.eup %502 }
 0x1f4   :  { %v385_v12 = vmul.f32 %v503_v11, %v383_v10 }
 0x1f6   :  { %v386_v13 = vsub.f32 2.0, %v385_v12 }
 0x1f8   :  { %v387_v14 = vmul.f32 %v503_v11, %v386_v13 }
 0x1fa   :  { %v388_v15 = vmul.f32 %v501_v3, %v387_v14 }
 0x1fc   :  { %389 = vst.msk [vmem:[#allocation2] sm:$0xff] %vm59_vm0, %v388_v15 }
 0x1fd   :  { %515 = shalt.err (!%p512_p4)
}
 0x1fe   :  { %s516_s27 = scalar_lea.hbm %s685_s7, 128 }
 0x1ff   :  { %p517_p5 = scmp.ne.s32.totalorder %s685_s7, %s516_s27  ;;  %p520_p6 = scmp.lt.u32.totalorder %s516_s27, %s685_s7 }
 0x201   :  { %p522_p7 = pnand %p520_p6, %p517_p5 }
 0x203   :  { %525 = shalt.err (!%p522_p7)
}
 0x204   :  { %403 = dma.vmem_to_hbm [thread:$0]  %s401_s23, 128, %s685_s7, [#allocation3]  }
 0x205   :  { %526 = dma.done.wait [#allocation3], 128  }
 0x206   :  { %527 = vsyncadd [#allocation3], 4294967168 }
 0x207   :  { %411 = vsyncpa [#allocation3], 1 }

</bundles_post_ra>
